<compile_context>
chip_gen: v7x
topology: tpu7x:2x2x1
jax: 0.10.0
libtpu: 0.0.40
codegen_flags: <defaults>
</compile_context>

<pallas_src>
import jax
import jax.numpy as jnp
from jax import lax
from jax.experimental import pallas as pl
from jax.experimental.pallas import tpu as pltpu

LOG_STD_MIN = -20.0
LOG_STD_MAX = 0.0
LEAKY_SLOPE = 0.01   # F.leaky_relu default negative_slope
MAX_TB = 4096        # batch-tile cap (lanes); VMEM use is tiny even at this size


def _netrelu1l1g_kernel(x_ref, w1_ref, b1_ref, w2_ref, b2_ref, mu_ref, sig_ref):
    # x: (TB, nin) native layout;  w1: (H, nin);  b1: (H, 1);  w2: (2, H);  b2: (2, 1)
    x_blk = x_ref[...]

    # fc1 + leaky_relu, feature-major:
    #   (H, nin) contracted with (TB, nin) over nin  ->  (H, TB)
    # (MXU ingests the transposed operand directly; no wrapper transpose of x.)
    z1 = lax.dot_general(
        w1_ref[...], x_blk,
        dimension_numbers=(((1,), (1,)), ((), ())),
        preferred_element_type=jnp.float32,
    ) + b1_ref[...]
    z1 = jnp.where(z1 > 0, z1, LEAKY_SLOPE * z1)

    # fc2: (2, H) @ (H, TB) + (2, 1) -> (2, TB); row 0 = mu head, row 1 = log_std head
    out = jnp.dot(w2_ref[...], z1, preferred_element_type=jnp.float32) + b2_ref[...]

    mu = out[0:1, :]                                                  # (1, TB)
    log_std = jnp.clip(out[1:2, :] - 1.0, LOG_STD_MIN, LOG_STD_MAX)   # only the log_std row
    sig = jnp.exp(log_std)                                            # (1, TB)

    # Lane-dense (1, TB) stores; tail lanes past B are masked by Pallas on writeback.
    mu_ref[...] = mu.astype(mu_ref.dtype)
    sig_ref[...] = sig.astype(sig_ref.dtype)


def netrelu1l1g_forward(x, w1, b1, w2, b2):
    """Fused forward of NetRelu1L1G.

    Args (PyTorch-native layouts):
      x : (B, nin) float32
      w1: (n_hidden, nin)   fc1.weight
      b1: (n_hidden,)       fc1.bias
      w2: (2, n_hidden)     fc2.weight
      b2: (2,)              fc2.bias
    Returns:
      (mu, sigma), each of shape (B,) — the parameters of Normal(mu, sigma).
    """
    B, nin = x.shape
    H = w1.shape[0]

    # One tile covering the whole batch when B is small; otherwise cap the tile and
    # let the grid cover the rest (partial tail block is masked by Pallas).
    TB = min(MAX_TB, max(128, ((B + 127) // 128) * 128))
    grid = (pl.cdiv(B, TB),)

    b1c = b1.reshape(H, 1).astype(jnp.float32)
    b2c = b2.reshape(2, 1).astype(jnp.float32)

    flops = 2 * B * H * nin + 2 * B * 2 * H + 4 * B * H
    cost = pl.CostEstimate(
        flops=int(flops),
        transcendentals=int(B),
        bytes_accessed=int(4 * (B * nin + H * nin + H + 2 * H + 2 + 2 * B)),
    )

    mu2, sig2 = pl.pallas_call(
        _netrelu1l1g_kernel,
        out_shape=(
            jax.ShapeDtypeStruct((1, B), jnp.float32),
            jax.ShapeDtypeStruct((1, B), jnp.float32),
        ),
        grid=grid,
        in_specs=[
            # x stays in its native (B, nin) layout, blocked along batch only.
            pl.BlockSpec((TB, nin), lambda i: (i, 0)),
            # Weights / biases: constant block index -> VMEM resident, no re-DMA.
            pl.BlockSpec((H, nin), lambda i: (0, 0)),
            pl.BlockSpec((H, 1), lambda i: (0, 0)),
            pl.BlockSpec((2, H), lambda i: (0, 0)),
            pl.BlockSpec((2, 1), lambda i: (0, 0)),
        ],
        out_specs=(
            pl.BlockSpec((1, TB), lambda i: (0, i)),
            pl.BlockSpec((1, TB), lambda i: (0, i)),
        ),
        compiler_params=pltpu.CompilerParams(
            dimension_semantics=("parallel",),           # shard batch across TCs on v7x
            vmem_limit_bytes=32 * 1024 * 1024,           # headroom vs v7x's 64 MiB VMEM
        ),
        cost_estimate=cost,
    )(x.astype(jnp.float32), w1.astype(jnp.float32), b1c,
      w2.astype(jnp.float32), b2c)

    # TODO(synk): torch.distributions.Normal(mu, sig) has no Pallas equivalent;
    # we return its parameters (mu, sigma) instead of a distribution object.
    return mu2.reshape(B), sig2.reshape(B)


if __name__ == "__main__":
    nin, n_hidden = 8, 64
    B = 200  # non-multiple of 128 -> exercises the masked partial-tail path

    key = jax.random.PRNGKey(0)
    kx, k1, k2, k3, k4 = jax.random.split(key, 5)

    x = jax.random.normal(kx, (B, nin), jnp.float32)

    # fc1: torch default-style uniform init
    bound1 = 1.0 / jnp.sqrt(jnp.float32(nin))
    w1 = jax.random.uniform(k1, (n_hidden, nin), jnp.float32, -bound1, bound1)
    b1 = jax.random.uniform(k2, (n_hidden,), jnp.float32, -bound1, bound1)
    # fc2: weight ~ N(0, 0.03) per the module, bias torch default uniform
    w2 = 0.03 * jax.random.normal(k3, (2, n_hidden), jnp.float32)
    bound2 = 1.0 / jnp.sqrt(jnp.float32(n_hidden))
    b2 = jax.random.uniform(k4, (2,), jnp.float32, -bound2, bound2)

    mu, sig = netrelu1l1g_forward(x, w1, b1, w2, b2)
    jax.block_until_ready((mu, sig))

    # Plain-JAX reference (PyTorch layout: y = x @ W.T + b)
    z1 = x @ w1.T + b1
    z1 = jnp.where(z1 > 0, z1, LEAKY_SLOPE * z1)
    out_ref = z1 @ w2.T + b2
    mu_ref = out_ref[:, 0]
    sig_ref = jnp.exp(jnp.clip(out_ref[:, 1] - 1.0, LOG_STD_MIN, LOG_STD_MAX))

    assert mu.shape == (B,) and sig.shape == (B,)
    assert jnp.allclose(mu, mu_ref, atol=1e-5), "mu mismatch vs reference"
    assert jnp.allclose(sig, sig_ref, atol=1e-5), "sigma mismatch vs reference"

    print("KERNEL_OK")
</pallas_src>

<mosaic_0001>
module attributes {stable_mosaic.version = 11 : i64} {
  func.func @_netrelu1l1g_kernel(%arg0: i32, %arg1: memref<256x8xf32, #tpu.memory_space<vmem>>, %arg2: memref<64x8xf32, #tpu.memory_space<vmem>>, %arg3: memref<64x1xf32, #tpu.memory_space<vmem>>, %arg4: memref<2x64xf32, #tpu.memory_space<vmem>>, %arg5: memref<2x1xf32, #tpu.memory_space<vmem>>, %arg6: memref<1x256xf32, #tpu.memory_space<vmem>>, %arg7: memref<1x256xf32, #tpu.memory_space<vmem>>) attributes {dimension_semantics = [#tpu.dimension_semantics<parallel>], iteration_bounds = array<i64: 1>, scalar_prefetch = 0 : i64, scratch_operands = 0 : i64, tpu.core_type = #tpu.core_type<tc>, window_params = [{transform_indices = @transform_0, window_bounds = array<i64: 256, 8>}, {pipeline_mode = #tpu.pipeline_mode<synchronous>, transform_indices = @transform_1, window_bounds = array<i64: 64, 8>}, {pipeline_mode = #tpu.pipeline_mode<synchronous>, transform_indices = @transform_2, window_bounds = array<i64: 64, 1>}, {pipeline_mode = #tpu.pipeline_mode<synchronous>, transform_indices = @transform_3, window_bounds = array<i64: 2, 64>}, {pipeline_mode = #tpu.pipeline_mode<synchronous>, transform_indices = @transform_4, window_bounds = array<i64: 2, 1>}, {transform_indices = @transform_5, window_bounds = array<i64: 1, 256>}, {transform_indices = @transform_6, window_bounds = array<i64: 1, 256>}]} {
    %c0 = arith.constant 0 : index
    %c0_0 = arith.constant 0 : index
    %0 = vector.load %arg1[%c0, %c0_0] : memref<256x8xf32, #tpu.memory_space<vmem>>, vector<256x8xf32>
    %c0_1 = arith.constant 0 : index
    %c0_2 = arith.constant 0 : index
    %1 = vector.load %arg2[%c0_1, %c0_2] : memref<64x8xf32, #tpu.memory_space<vmem>>, vector<64x8xf32>
    %cst = arith.constant dense<0.000000e+00> : vector<64x256xf32>
    %2 = tpu.matmul %1, %0, %cst {dimension_numbers = #tpu.dot_dimension_numbers<[1], [1], [0], [0], [0, 0, 1, 0], [], []>} : vector<64x8xf32>, vector<256x8xf32>, vector<64x256xf32> -> vector<64x256xf32>
    %c0_3 = arith.constant 0 : index
    %c0_4 = arith.constant 0 : index
    %3 = vector.load %arg3[%c0_3, %c0_4] : memref<64x1xf32, #tpu.memory_space<vmem>>, vector<64x1xf32>
    %4 = vector.broadcast %3 : vector<64x1xf32> to vector<64x256xf32>
    %5 = arith.addf %2, %4 : vector<64x256xf32>
    %cst_5 = arith.constant 0.000000e+00 : f32
    %6 = vector.broadcast %cst_5 : f32 to vector<64x256xf32>
    %7 = arith.cmpf ogt, %5, %6 : vector<64x256xf32>
    %cst_6 = arith.constant 0.00999999977 : f32
    %8 = vector.broadcast %cst_6 : f32 to vector<64x256xf32>
    %9 = arith.mulf %8, %5 : vector<64x256xf32>
    %10 = arith.select %7, %5, %9 : vector<64x256xi1>, vector<64x256xf32>
    %c0_7 = arith.constant 0 : index
    %c0_8 = arith.constant 0 : index
    %11 = vector.load %arg4[%c0_7, %c0_8] : memref<2x64xf32, #tpu.memory_space<vmem>>, vector<2x64xf32>
    %cst_9 = arith.constant dense<0.000000e+00> : vector<2x256xf32>
    %12 = tpu.matmul %11, %10, %cst_9 {dimension_numbers = #tpu.dot_dimension_numbers<[1], [0], [0], [1], [0, 0, 1, 1], [], []>} : vector<2x64xf32>, vector<64x256xf32>, vector<2x256xf32> -> vector<2x256xf32>
    %c0_10 = arith.constant 0 : index
    %c0_11 = arith.constant 0 : index
    %13 = vector.load %arg5[%c0_10, %c0_11] : memref<2x1xf32, #tpu.memory_space<vmem>>, vector<2x1xf32>
    %14 = vector.broadcast %13 : vector<2x1xf32> to vector<2x256xf32>
    %15 = arith.addf %12, %14 : vector<2x256xf32>
    %16 = vector.extract_strided_slice %15 {offsets = [0, 0], sizes = [1, 256], strides = [1, 1]} : vector<2x256xf32> to vector<1x256xf32>
    %17 = vector.extract_strided_slice %15 {offsets = [1, 0], sizes = [1, 256], strides = [1, 1]} : vector<2x256xf32> to vector<1x256xf32>
    %cst_12 = arith.constant 1.000000e+00 : f32
    %18 = vector.broadcast %cst_12 : f32 to vector<1x256xf32>
    %19 = arith.subf %17, %18 : vector<1x256xf32>
    %cst_13 = arith.constant -2.000000e+01 : f32
    %cst_14 = arith.constant 0.000000e+00 : f32
    %20 = vector.broadcast %cst_13 : f32 to vector<1x256xf32>
    %21 = arith.maximumf %20, %19 : vector<1x256xf32>
    %22 = vector.broadcast %cst_14 : f32 to vector<1x256xf32>
    %23 = arith.minimumf %22, %21 : vector<1x256xf32>
    %24 = math.exp %23 : vector<1x256xf32>
    %c0_15 = arith.constant 0 : index
    %c0_16 = arith.constant 0 : index
    %25 = vector.load %arg6[%c0_15, %c0_16] : memref<1x256xf32, #tpu.memory_space<vmem>>, vector<1x256xf32>
    tpu.vector_store %arg6[%c0_15, %c0_16], %16 {strides = array<i32>} : memref<1x256xf32, #tpu.memory_space<vmem>>, vector<1x256xf32>,
    %c0_17 = arith.constant 0 : index
    %c0_18 = arith.constant 0 : index
    %26 = vector.load %arg7[%c0_17, %c0_18] : memref<1x256xf32, #tpu.memory_space<vmem>>, vector<1x256xf32>
    tpu.vector_store %arg7[%c0_17, %c0_18], %24 {strides = array<i32>} : memref<1x256xf32, #tpu.memory_space<vmem>>, vector<1x256xf32>,
    return
  }
  func.func @transform_0(%arg0: i32) -> (i32, i32) {
    %c0_i32 = arith.constant 0 : i32
    %c0_i32_0 = arith.constant 0 : i32
    return %arg0, %c0_i32 : i32, i32
  }
  func.func @transform_1(%arg0: i32) -> (i32, i32) {
    %c0_i32 = arith.constant 0 : i32
    %c0_i32_0 = arith.constant 0 : i32
    %c0_i32_1 = arith.constant 0 : i32
    return %c0_i32, %c0_i32_0 : i32, i32
  }
  func.func @transform_2(%arg0: i32) -> (i32, i32) {
    %c0_i32 = arith.constant 0 : i32
    %c0_i32_0 = arith.constant 0 : i32
    %c0_i32_1 = arith.constant 0 : i32
    return %c0_i32, %c0_i32_0 : i32, i32
  }
  func.func @transform_3(%arg0: i32) -> (i32, i32) {
    %c0_i32 = arith.constant 0 : i32
    %c0_i32_0 = arith.constant 0 : i32
    %c0_i32_1 = arith.constant 0 : i32
    return %c0_i32, %c0_i32_0 : i32, i32
  }
  func.func @transform_4(%arg0: i32) -> (i32, i32) {
    %c0_i32 = arith.constant 0 : i32
    %c0_i32_0 = arith.constant 0 : i32
    %c0_i32_1 = arith.constant 0 : i32
    return %c0_i32, %c0_i32_0 : i32, i32
  }
  func.func @transform_5(%arg0: i32) -> (i32, i32) {
    %c0_i32 = arith.constant 0 : i32
    %c0_i32_0 = arith.constant 0 : i32
    return %c0_i32, %arg0 : i32, i32
  }
  func.func @transform_6(%arg0: i32) -> (i32, i32) {
    %c0_i32 = arith.constant 0 : i32
    %c0_i32_0 = arith.constant 0 : i32
    return %c0_i32, %arg0 : i32, i32
  }
}

</mosaic_0001>

<bundles_post_ra>
// kernel: tpu_custom_call.1
= control target key start
LH: loop header
LB: loop body
LE: loop exit
PB: predicated region body
PF: predicated region fallthrough
CT: control target
= control target key end

     0   :  { %12 = vsyncpa [#allocation3], 0  ;;  %vm112_vm0 = vcmask 64512   ;;  %v771_v7 = vmov 0   ;;  %s1051_s0 = inlined_call_operand.vmem [shape: f32[200,8], index: 0, kind: input, shape index: {}]   ;;  %s1052_s1 = inlined_call_operand.vmem [shape: f32[64,8], index: 1, kind: input, shape index: {}]   ;;  %s1053_s2 = inlined_call_operand.vmem [shape: f32[64,1], index: 2, kind: input, shape index: {}]   ;;  %s1054_s3 = inlined_call_operand.vmem [shape: f32[2,64], index: 3, kind: input, shape index: {}]   ;;  %s1055_s4 = inlined_call_operand.vmem [shape: f32[2,1], index: 4, kind: input, shape index: {}]   ;;  %s1056_s5 = inlined_call_operand.hbm [shape: f32[1,200], index: 5, kind: output, shape index: {0}]   ;;  %s1057_s6 = inlined_call_operand.hbm [shape: f32[1,200], index: 6, kind: output, shape index: {1}]  }
   0x1   :  { %v40_v0 = vld [vmem:[%s1051_s0 + $0x80] sm:$0xff]  ;;  %v41_v1 = vld [vmem:[%s1051_s0 + $0x88] sm:$0xff]  ;;  %vm822_vm1 = vmpackc.low %vm112_vm0, %vm112_vm0  ;;  %717 = vset.pattern.permute.xlu0 %v771_v7  ;;  %718 = vset.pattern.permute.xlu1 %v771_v7 }
   0x2   :  { %v24_v2 = vld [vmem:[%s1051_s0] sm:$0xff]  ;;  %v648_v3 = vpack.c.bf16 %v41_v1, %v40_v0  ;;  %v25_v5 = vld [vmem:[%s1051_s0 + $0x8] sm:$0xff]  ;;  %v42_v6 = vld [vmem:[%s1051_s0 + $0x90] sm:$0xff] }
   0x3   :  { %v651_v8 = vpack.c.bf16 %v25_v5, %v24_v2  ;;  %v43_v9 = vld [vmem:[%s1051_s0 + $0x98] sm:$0xff]  ;;  %v26_v11 = vld [vmem:[%s1051_s0 + $0x10] sm:$0xff]  ;;  %v44_v13 = vld [vmem:[%s1051_s0 + $0xa0] sm:$0xff] }
   0x4   :  { %650 = vmatprep.subr.msk.bf16.mxu0 %vm822_vm1, %v648_v3  ;;  %v654_v10 = vpack.c.bf16 %v43_v9, %v42_v6  ;;  %v27_v12 = vld [vmem:[%s1051_s0 + $0x18] sm:$0xff]  ;;  %v45_v14 = vld [vmem:[%s1051_s0 + $0xa8] sm:$0xff]  ;;  %v856_v17 = vld [vmem:[%s1052_s1] sm:$0xff] }
   0x5   :  { %653 = vmatpush3.bf16.xpose.msk.msra.mxu0 %vm822_vm1, %v651_v8  ;;  %v657_v15 = vpack.c.bf16 %v27_v12, %v26_v11  ;;  %v660_v16 = vpack.c.bf16 %v45_v14, %v44_v13  ;;  %632 = vmatprep.mubr.msk.f32.mxu0 %vm112_vm0, %v856_v17  ;;  %v28_v18 = vld [vmem:[%s1051_s0 + $0x20] sm:$0xff]  ;;  %v29_v19 = vld [vmem:[%s1051_s0 + $0x28] sm:$0xff]  ;;  %v46_v21 = vld [vmem:[%s1051_s0 + $0xb0] sm:$0xff] }
   0x6   :  { %656 = vmatprep.subr.msk.bf16.mxu0 %vm822_vm1, %v654_v10  ;;  %v64_v20 = vld [vmem:[%s1053_s2] sm:$0xff]  ;;  %v47_v22 = vld [vmem:[%s1051_s0 + $0xb8] sm:$0xff]  ;;  %v66_v23 = vld [vmem:[%s1053_s2 + $0x10] sm:$0xff]  ;;  %v663_v25 = vpack.c.bf16 %v29_v19, %v28_v18 }
   0x7   :  { %74 = vperm.xlu0 %717, %v64_v20   ;;  %v65_v24 = vld [vmem:[%s1053_s2 + $0x8] sm:$0xff]  ;;  %84 = vperm.xlu1 %718, %v66_v23   ;;  %v67_v26 = vld [vmem:[%s1053_s2 + $0x18] sm:$0xff] }
   0xd   :  { %659 = vmatpush3.bf16.xpose.msk.msra.mxu0 %vm822_vm1, %v657_v15 }
   0xe   :  { %662 = vmatprep.subr.msk.bf16.mxu0 %vm822_vm1, %v660_v16 }
   0xf   :  { %13 = vsyncpa [#allocation5], 0  ;;  %v666_v27 = vpack.c.bf16 %v47_v22, %v46_v21  ;;  %79 = vperm.xlu0 %717, %v65_v24   ;;  %v68_v28 = vld [vmem:[%s1053_s2 + $0x20] sm:$0xff]  ;;  %89 = vperm.xlu1 %718, %v67_v26   ;;  %v69_v29 = vld [vmem:[%s1053_s2 + $0x28] sm:$0xff]  ;;  %v772_v3 = vmov 0.0   ;;  %s774_s19 = smov [#allocation2]  }
  0x10   :  { %v30_v30 = vld [vmem:[%s1051_s0 + $0x30] sm:$0xff]  ;;  %v31_v31 = vld [vmem:[%s1051_s0 + $0x38] sm:$0xff]  ;;  %v48_v32 = vld [vmem:[%s1051_s0 + $0xc0] sm:$0xff]  ;;  %469 = vmatprep.mubr.f32.mxu1 %v772_v3  ;;  %s535_s20 = sshll.u32 %s774_s19, 4  ;;  %s536_s20 = int_to_ptr.vmem [resolvable:$true] %s535_s20 }
  0x11   :  { %v49_v33 = vld [vmem:[%s1051_s0 + $0xc8] sm:$0xff]  ;;  %v70_v34 = vld [vmem:[%s1053_s2 + $0x30] sm:$0xff]  ;;  %v669_v35 = vpack.c.bf16 %v31_v31, %v30_v30  ;;  %v71_v36 = vld [vmem:[%s1053_s2 + $0x38] sm:$0xff]  ;;  %p728_p1 = scmp.lt.s32.totalorder %s536_s20, %s536_s20 }
  0x12   :  { %v672_v37 = vpack.c.bf16 %v49_v33, %v48_v32  ;;  %v395_v38 = vld [vmem:[%s1055_s4] sm:$0x3]  ;;  %v33_v40 = vld [vmem:[%s1051_s0 + $0x48] sm:$0xff]  ;;  %v50_v41 = vld [vmem:[%s1051_s0 + $0xd0] sm:$0xff] }
  0x13   :  { %94 = vperm.xlu0 %717, %v68_v28   ;;  %99 = vperm.xlu1 %718, %v69_v29   ;;  %v32_v39 = vld [vmem:[%s1051_s0 + $0x40] sm:$0xff]  ;;  %v51_v42 = vld [vmem:[%s1051_s0 + $0xd8] sm:$0xff]  ;;  %v34_v45 = vld [vmem:[%s1051_s0 + $0x50] sm:$0xff] }
  0x14   :  { %v675_v43 = vpack.c.bf16 %v33_v40, %v32_v39  ;;  %v678_v44 = vpack.c.bf16 %v51_v42, %v50_v41  ;;  %v35_v46 = vld [vmem:[%s1051_s0 + $0x58] sm:$0xff]  ;;  %v52_v47 = vld [vmem:[%s1051_s0 + $0xe0] sm:$0xff]  ;;  %v53_v48 = vld [vmem:[%s1051_s0 + $0xe8] sm:$0xff] }
  0x15   :  { %665 = vmatpush3.bf16.xpose.msk.msra.mxu0 %vm822_vm1, %v663_v25  ;;  %v681_v49 = vpack.c.bf16 %v35_v46, %v34_v45  ;;  %v684_v50 = vpack.c.bf16 %v53_v48, %v52_v47  ;;  %v36_v51 = vld [vmem:[%s1051_s0 + $0x60] sm:$0xff]  ;;  %v37_v52 = vld [vmem:[%s1051_s0 + $0x68] sm:$0xff]  ;;  %v54_v53 = vld [vmem:[%s1051_s0 + $0xf0] sm:$0xff] }
  0x16   :  { %668 = vmatprep.subr.msk.bf16.mxu0 %vm822_vm1, %v666_v27  ;;  %v55_v54 = vld [vmem:[%s1051_s0 + $0xf8] sm:$0xff]  ;;  %v687_v55 = vpack.c.bf16 %v37_v52, %v36_v51  ;;  %v38_v57 = vld [vmem:[%s1051_s0 + $0x70] sm:$0xff]  ;;  %v57_v60 = vld [vmem:[%s1052_s1 + $0x8] sm:$0xff] }
  0x17   :  { %104 = vperm.xlu0 %717, %v70_v34   ;;  %109 = vperm.xlu1 %718, %v71_v36   ;;  %v690_v56 = vpack.c.bf16 %v55_v54, %v54_v53  ;;  %v39_v58 = vld [vmem:[%s1051_s0 + $0x78] sm:$0xff]  ;;  %v58_v61 = vld [vmem:[%s1052_s1 + $0x10] sm:$0xff]  ;;  %v60_v63 = vld [vmem:[%s1052_s1 + $0x20] sm:$0xff] }
  0x18   :  { %v693_v59 = vpack.c.bf16 %v39_v58, %v38_v57  ;;  %v59_v62 = vld [vmem:[%s1052_s1 + $0x18] sm:$0xff]  ;;  %v61_v0 = vld [vmem:[%s1052_s1 + $0x28] sm:$0xff]  ;;  %v62_v1 = vld [vmem:[%s1052_s1 + $0x30] sm:$0xff] }
  0x19   :  { %v63_v2 = vld [vmem:[%s1052_s1 + $0x38] sm:$0xff] }
  0x1b   :  { %398 = vperm.xlu0 %717, %v395_v38  }
  0x1d   :  { %671 = vmatpush3.bf16.xpose.msk.msra.mxu0 %vm822_vm1, %v669_v35 }
  0x1e   :  { %674 = vmatprep.subr.msk.bf16.mxu0 %vm822_vm1, %v672_v37 }
  0x25   :  { %677 = vmatpush3.bf16.xpose.msk.msra.mxu0 %vm822_vm1, %v675_v43 }
  0x26   :  { %680 = vmatprep.subr.msk.bf16.mxu0 %vm822_vm1, %v678_v44 }
  0x2d   :  { %683 = vmatpush3.bf16.xpose.msk.msra.mxu0 %vm822_vm1, %v681_v49 }
  0x2e   :  { %686 = vmatprep.subr.msk.bf16.mxu0 %vm822_vm1, %v684_v50 }
  0x35   :  { %689 = vmatpush3.bf16.xpose.msk.msra.mxu0 %vm822_vm1, %v687_v55 }
  0x36   :  { %692 = vmatprep.subr.msk.bf16.mxu0 %vm822_vm1, %v690_v56 }
  0x3d   :  { %695 = vmatpush3.bf16.xpose.msk.msra.mxu0 %vm822_vm1, %v693_v59 }
  0x44   :  { %633 = vmatmul.mubr.msk.f32.vlgmr.msra.gmra.mrb[0].mxu0 %vm112_vm0, %v856_v17 }
  0x45   :  { %634 = vmatprep.mubr.msk.f32.mxu0 %vm112_vm0, %v57_v60 }
  0x48   :  { %635 = vmatmul.mubr.msk.f32.gmra.mrb[2].mxu0 %vm112_vm0, %v57_v60 }
  0x49   :  { %636 = vmatprep.mubr.msk.f32.mxu0 %vm112_vm0, %v58_v61 }
  0x4c   :  { %637 = vmatmul.mubr.msk.f32.gmra.mrb[4].mxu0 %vm112_vm0, %v58_v61 }
  0x4d   :  { %638 = vmatprep.mubr.msk.f32.mxu0 %vm112_vm0, %v59_v62 }
  0x50   :  { %639 = vmatmul.mubr.msk.f32.gmra.mrb[6].mxu0 %vm112_vm0, %v59_v62 }
  0x51   :  { %640 = vmatprep.mubr.msk.f32.mxu0 %vm112_vm0, %v60_v63 }
  0x54   :  { %641 = vmatmul.mubr.msk.f32.gmra.mrb[8].mxu0 %vm112_vm0, %v60_v63 }
  0x55   :  { %642 = vmatprep.mubr.msk.f32.mxu0 %vm112_vm0, %v61_v0 }
  0x58   :  { %643 = vmatmul.mubr.msk.f32.gmra.mrb[10].mxu0 %vm112_vm0, %v61_v0 }
  0x59   :  { %644 = vmatprep.mubr.msk.f32.mxu0 %vm112_vm0, %v62_v1 }
  0x5c   :  { %645 = vmatmul.mubr.msk.f32.gmra.mrb[12].mxu0 %vm112_vm0, %v62_v1 }
  0x5d   :  { %646 = vmatprep.mubr.msk.f32.mxu0 %vm112_vm0, %v63_v2 }
  0x60   :  { %647 = vmatmul.mubr.msk.f32.gmra.mrb[14].mxu0 %vm112_vm0, %v63_v2 }
  0x86   :  { %v75_v4 = vpop.permute.xlu0 %74  ;;  %v85_v15 = vpop.permute.xlu1 %84 }
  0x8e   :  { %v80_v9 = vpop.permute.xlu0 %79  ;;  %v90_v29 = vpop.permute.xlu1 %89 }
  0x92   :  { %v95_v37 = vpop.permute.xlu0 %94  ;;  %v100_v49 = vpop.permute.xlu1 %99 }
  0x96   :  { %v105_v57 = vpop.permute.xlu0 %104 }
 0x117   :  { %v299_v5 = vpop.f32.mrb[0].mxu0 }
 0x118   :  { %v300_v6 = vadd.f32 %v299_v5, %v75_v4  ;;  %v301_v7 = vpop.f32.mrb[1].mxu0  ;;  %v110_v5 = vpop.permute.xlu1 %109 }
 0x119   :  { %v302_v8 = vadd.f32 %v301_v7, %v75_v4 }
 0x11a   :  { %v362_v11 = vmul.f32 0.01, %v300_v6  ;;  %vm346_vm2 = vcmp.gt.f32.partialorder %v300_v6, 0.0 }
 0x11b   :  { %v305_v10 = vpop.f32.mrb[2].mxu0  ;;  %v363_v14 = vmul.f32 0.01, %v302_v8  ;;  %vm347_vm3 = vcmp.gt.f32.partialorder %v302_v8, 0.0 }
 0x11c   :  { %v306_v12 = vadd.f32 %v305_v10, %v80_v9  ;;  %v307_v13 = vpop.f32.mrb[3].mxu0  ;;  %v378_v22 = vsel %vm346_vm2, %v300_v6, %v362_v11  ;;  %vm401_vm2 = vcmask 523264  }
 0x11d   :  { %v308_v16 = vadd.f32 %v307_v13, %v80_v9  ;;  %v379_v25 = vsel %vm347_vm3, %v302_v8, %v363_v14 }
 0x11e   :  { %v364_v17 = vmul.f32 0.01, %v306_v12  ;;  %vm348_vm4 = vcmp.gt.f32.partialorder %v306_v12, 0.0 }
 0x11f   :  { %v365_v18 = vmul.f32 0.01, %v308_v16  ;;  %v311_v19 = vpop.f32.mrb[4].mxu0  ;;  %vm349_vm5 = vcmp.gt.f32.partialorder %v308_v16, 0.0 }
 0x120   :  { %v312_v20 = vadd.f32 %v311_v19, %v85_v15  ;;  %v313_v21 = vpop.f32.mrb[5].mxu0  ;;  %v380_v23 = vsel %vm348_vm4, %v306_v12, %v364_v17 }
 0x121   :  { %v314_v24 = vadd.f32 %v313_v21, %v85_v15  ;;  %v381_v26 = vsel %vm349_vm5, %v308_v16, %v365_v18  ;;  %v698_v27 = vpack.c.bf16 %v380_v23, %v378_v22  ;;  %v773_v21 = vmov 1966171168  }
 0x122   :  { %v696_v28 = vpack.c.bf16 %v381_v26, %v379_v25  ;;  %v366_v31 = vmul.f32 0.01, %v312_v20  ;;  %vm350_vm6 = vcmp.gt.f32.partialorder %v312_v20, 0.0  ;;  %v490_v22 = vunpack.c.l.s4 %v773_v21  ;;  %v399_v26 = vpop.permute.xlu0 %398 }
 0x123   :  { %v317_v30 = vpop.f32.mrb[6].mxu0  ;;  %v367_v34 = vmul.f32 0.01, %v314_v24  ;;  %vm351_vm7 = vcmp.gt.f32.partialorder %v314_v24, 0.0  ;;  %v492_v23 = vlaneseq }
 0x124   :  { %v318_v32 = vadd.f32 %v317_v30, %v90_v29  ;;  %v319_v33 = vpop.f32.mrb[7].mxu0  ;;  %697 = vmatprep.subr.bf16.mxu1 %v696_v28  ;;  %v382_v42 = vsel %vm350_vm6, %v312_v20, %v366_v31  ;;  %v394_v20 = vld [vmem:[%s1054_s3] sm:$0x3]  ;;  %s723_s3 = scalar_lea.vmem %s536_s20, 32 }
 0x125   :  { %v320_v35 = vadd.f32 %v319_v33, %v90_v29  ;;  %699 = vmatpush1.bf16.msra.mxu1 %v698_v27  ;;  %v383_v45 = vsel %vm351_vm7, %v314_v24, %v367_v34  ;;  %v491_v24 = vunpack.c.0.s8 %v490_v22  ;;  %v493_v25 = vshrl.u32 %v492_v23, 7  ;;  %p724_p0 = scmp.ne.s32.totalorder %s536_s20, %s723_s3  ;;  %p729_p2 = scmp.lt.s32.totalorder %s723_s3, %s723_s3 }
 0x126   :  { %vm352_vm8 = vcmp.gt.f32.partialorder %v318_v32, 0.0  ;;  %v368_v36 = vmul.f32 0.01, %v318_v32  ;;  %vm1019_vm3 = vcmp.lt.s32.totalorder %v492_v23, 256 }
 0x127   :  { %vm353_vm9 = vcmp.gt.f32.partialorder %v320_v35, 0.0  ;;  %v369_v38 = vmul.f32 0.01, %v320_v35  ;;  %v323_v39 = vpop.f32.mrb[8].mxu0  ;;  %v494_v31 = vsub.s32 %v491_v24, %v493_v25  ;;  %p730_p3 = por %p729_p2, %p728_p1 }
 0x128   :  { %v324_v40 = vadd.f32 %v323_v39, %v95_v37  ;;  %v325_v41 = vpop.f32.mrb[9].mxu0  ;;  %v384_v43 = vsel %vm352_vm8, %v318_v32, %v368_v36 }
 0x129   :  { %v326_v44 = vadd.f32 %v325_v41, %v95_v37  ;;  %v385_v46 = vsel %vm353_vm9, %v320_v35, %v369_v38  ;;  %v702_v47 = vpack.c.bf16 %v384_v43, %v382_v42  ;;  %p731_p4 = pnand %p730_p3, %p724_p0 }
 0x12a   :  { %v700_v48 = vpack.c.bf16 %v385_v46, %v383_v45  ;;  %v370_v51 = vmul.f32 0.01, %v324_v40  ;;  %vm354_vm10 = vcmp.gt.f32.partialorder %v324_v40, 0.0 }
 0x12b   :  { %v329_v50 = vpop.f32.mrb[10].mxu0  ;;  %v371_v54 = vmul.f32 0.01, %v326_v44  ;;  %vm355_vm11 = vcmp.gt.f32.partialorder %v326_v44, 0.0 }
 0x12c   :  { %v330_v52 = vadd.f32 %v329_v50, %v100_v49  ;;  %v331_v53 = vpop.f32.mrb[11].mxu0  ;;  %701 = vmatprep.subr.bf16.mxu1 %v700_v48  ;;  %v386_v62 = vsel %vm354_vm10, %v324_v40, %v370_v51 }
 0x12d   :  { %v332_v55 = vadd.f32 %v331_v53, %v100_v49  ;;  %703 = vmatpush1.bf16.msra.mxu1 %v702_v47  ;;  %v387_v1 = vsel %vm355_vm11, %v326_v44, %v371_v54 }
 0x12e   :  { %vm356_vm12 = vcmp.gt.f32.partialorder %v330_v52, 0.0  ;;  %v372_v56 = vmul.f32 0.01, %v330_v52 }
 0x12f   :  { %vm357_vm13 = vcmp.gt.f32.partialorder %v332_v55, 0.0  ;;  %v373_v58 = vmul.f32 0.01, %v332_v55  ;;  %v335_v59 = vpop.f32.mrb[12].mxu0 }
 0x130   :  { %v336_v60 = vadd.f32 %v335_v59, %v105_v57  ;;  %v337_v61 = vpop.f32.mrb[13].mxu0  ;;  %v388_v63 = vsel %vm356_vm12, %v330_v52, %v372_v56 }
 0x131   :  { %v338_v0 = vadd.f32 %v337_v61, %v105_v57  ;;  %v389_v2 = vsel %vm357_vm13, %v332_v55, %v373_v58  ;;  %v706_v3 = vpack.c.bf16 %v388_v63, %v386_v62 }
 0x132   :  { %v704_v4 = vpack.c.bf16 %v389_v2, %v387_v1  ;;  %v374_v7 = vmul.f32 0.01, %v336_v60  ;;  %vm358_vm14 = vcmp.gt.f32.partialorder %v336_v60, 0.0 }
 0x133   :  { %v341_v6 = vpop.f32.mrb[14].mxu0  ;;  %v375_v10 = vmul.f32 0.01, %v338_v0  ;;  %vm359_vm15 = vcmp.gt.f32.partialorder %v338_v0, 0.0 }
 0x134   :  { %v342_v8 = vadd.f32 %v341_v6, %v110_v5  ;;  %v343_v9 = vpop.f32.mrb[15].mxu0  ;;  %705 = vmatprep.subr.bf16.mxu1 %v704_v4  ;;  %v390_v14 = vsel %vm358_vm14, %v336_v60, %v374_v7 }
 0x135   :  { %v344_v11 = vadd.f32 %v343_v9, %v110_v5  ;;  %707 = vmatpush1.bf16.msra.mxu1 %v706_v3  ;;  %v391_v16 = vsel %vm359_vm15, %v338_v0, %v375_v10 }
 0x136   :  { %vm360_vm0 = vcmp.gt.f32.partialorder %v342_v8, 0.0  ;;  %v376_v12 = vmul.f32 0.01, %v342_v8 }
 0x137   :  { %vm361_vm1 = vcmp.gt.f32.partialorder %v344_v11, 0.0  ;;  %v377_v13 = vmul.f32 0.01, %v344_v11 }
 0x138   :  { %v392_v15 = vsel %vm360_vm0, %v342_v8, %v376_v12 }
 0x139   :  { %v393_v17 = vsel %vm361_vm1, %v344_v11, %v377_v13  ;;  %v710_v18 = vpack.c.bf16 %v392_v15, %v390_v14 }
 0x13a   :  { %v708_v19 = vpack.c.bf16 %v393_v17, %v391_v16 }
 0x13c   :  { %709 = vmatprep.subr.bf16.mxu1 %v708_v19 }
 0x13d   :  { %711 = vmatpush1.bf16.msra.mxu1 %v710_v18 }
 0x140   :  { %597 = vmatmul.mubr.msk.f32.vlgmr.msra.gmra.mrb[0].mxu1 %vm401_vm2, %v394_v20 }
 0x213   :  { %v471_v27 = vpop.f32.mrb[0].mxu1 }
 0x214   :  { %v472_v28 = vadd.f32 %v471_v27, %v399_v26  ;;  %v473_v29 = vpop.f32.mrb[1].mxu1 }
 0x215   :  { %v474_v30 = vadd.f32 %v473_v29, %v399_v26 }
 0x216   :  { %v598_v32 = vadd.f32 -1.0, %v472_v28 }
 0x217   :  { %v599_v33 = vadd.f32 -1.0, %v474_v30  ;;  %v488_v34 = vcombine.low %v472_v28, %v474_v30 }
 0x218   :  { %v478_v35 = vmax.f32 %v598_v32, -20.0 }
 0x219   :  { %v479_v36 = vmax.f32 %v599_v33, -20.0  ;;  %v495_v37 = vrot.slane %v488_v34, %v494_v31 }
 0x21a   :  { %v480_v38 = vmin.f32 %v478_v35, 0.0 }
 0x21b   :  { %v481_v40 = vmin.f32 %v479_v36, 0.0  ;;  %v502_v41 = vrot.slane %v495_v37, %v494_v31 }
 0x21c   :  { %v482_v42 = vmul.f32 1.442695, %v480_v38 }
 0x21d   :  { %v484_v43 = vmul.f32 1.442695, %v481_v40  ;;  %508 = vst.msk [vmem:[#allocation2] sm:$0x3] %vm1019_vm3, %v502_v41 }
 0x21e   :  { %719 = vpow2.f32 %v482_v42 }
 0x21f   :  { %734 = shalt.err (!%p731_p4)
}
 0x220   :  { %s735_s23 = scalar_lea.hbm %s1056_s5, 32 }
 0x221   :  { %p736_p5 = scmp.ne.s32.totalorder %s1056_s5, %s735_s23  ;;  %p739_p6 = scmp.lt.u32.totalorder %s735_s23, %s1056_s5 }
 0x223   :  { %p741_p7 = pnand %p739_p6, %p736_p5 }
 0x225   :  { %744 = shalt.err (!%p741_p7)
}
 0x226   :  { %538 = dma.vmem_to_hbm [thread:$0]  %s536_s20, 32, %s1056_s5, [#allocation3]   ;;  %721 = vpow2.f32 %v484_v43 }
 0x227   :  { %s775_s30 = smov [#allocation4]  }
 0x228   :  { %v720_v44 = vpop.eup %719  ;;  %s545_s7 = sshll.u32 %s775_s30, 4  ;;  %s546_s7 = int_to_ptr.vmem [resolvable:$true] %s545_s7 }
 0x229   :  { %s745_s8 = scalar_lea.vmem %s546_s7, 32  ;;  %p750_p9 = scmp.lt.s32.totalorder %s546_s7, %s546_s7 }
 0x22a   :  { %p746_p8 = scmp.ne.s32.totalorder %s546_s7, %s745_s8  ;;  %p751_p10 = scmp.lt.s32.totalorder %s745_s8, %s745_s8 }
 0x22c   :  { %p752_p11 = por %p751_p10, %p750_p9 }
 0x22e   :  { %p753_p12 = pnand %p752_p11, %p746_p8 }
 0x230   :  { %v722_v45 = vpop.eup %721 }
 0x231   :  { %v511_v46 = vcombine.low %v720_v44, %v722_v45 }
 0x233   :  { %v518_v47 = vrot.slane %v511_v46, %v494_v31 }
 0x235   :  { %v519_v48 = vcombine.high %v518_v47, %v518_v47 }
 0x237   :  { %v526_v49 = vrot.slane %v519_v48, %v494_v31 }
 0x239   :  { %528 = vst.msk [vmem:[#allocation4] sm:$0x3] %vm1019_vm3, %v526_v49 }
 0x23a   :  { %756 = shalt.err (!%p753_p12)
}
 0x23b   :  { %s757_s9 = scalar_lea.hbm %s1057_s6, 32 }
 0x23c   :  { %p758_p13 = scmp.ne.s32.totalorder %s1057_s6, %s757_s9  ;;  %p761_p0 = scmp.lt.u32.totalorder %s757_s9, %s1057_s6 }
 0x23e   :  { %p763_p1 = pnand %p761_p0, %p758_p13 }
 0x240   :  { %766 = shalt.err (!%p763_p1)
}
 0x241   :  { %548 = dma.vmem_to_hbm [thread:$0]  %s546_s7, 32, %s1057_s6, [#allocation5]  }
 0x242   :  { %767 = dma.done.wait [#allocation3], 32  }
 0x243   :  { %768 = vsyncadd [#allocation3], 4294967264 }
 0x244   :  { %769 = dma.done.wait [#allocation5], 32  }
 0x245   :  { %770 = vsyncadd [#allocation5], 4294967264 }
 0x246   :  { %555 = vsyncpa [#allocation3], 1 }
 0x247   :  { %556 = vsyncpa [#allocation5], 1 }

</bundles_post_ra>
